<compile_context>
chip_gen: v7x
topology: tpu7x:2x2x1
jax: 0.10.0
libtpu: 0.0.40
codegen_flags: <defaults>
</compile_context>

<pallas_src>
import math
import functools

import jax
import jax.numpy as jnp
from jax import lax
from jax.experimental import pallas as pl
from jax.experimental.pallas import tpu as pltpu


_VMEM_LIMIT_BYTES = 48 * 1024 * 1024  # <= v7x's 64 MiB physical VMEM, > v5e's 16 MiB default.


# ----------------------------- Kernel 1: QKV projection -----------------------------

def _qkv_proj_kernel(x_ref, wq_ref, wk_ref, wv_ref, q_ref, kt_ref, v_ref, *, scale):
    xt = x_ref[0]                                                   # (tn, D)
    q = lax.dot_general(xt, wq_ref[...], (((1,), (0,)), ((), ())),
                        preferred_element_type=jnp.float32)         # (tn, QK)
    q_ref[0] = (q * scale).astype(q_ref.dtype)                      # fold SDPA scale into q
    # K emitted already transposed: (QK, tn) = Wk^T @ x^T -> score matmul is plain [m,k]x[k,n].
    kt = lax.dot_general(wk_ref[...], xt, (((0,), (1,)), ((), ())),
                         preferred_element_type=jnp.float32)        # (QK, tn)
    kt_ref[0] = kt.astype(kt_ref.dtype)
    v = lax.dot_general(xt, wv_ref[...], (((1,), (0,)), ((), ())),
                        preferred_element_type=jnp.float32)         # (tn, D)
    v_ref[0] = v.astype(v_ref.dtype)


# ------------------- Kernel 2: flash attention + output projection -------------------

def _flash_attn_kernel(q_ref, kt_ref, v_ref, wp_ref, o_ref,
                       m_scr, l_scr, acc_scr, *, heads, d_qk, d_v):
    ki = pl.program_id(2)
    nk = pl.num_programs(2)

    # ---- reset online-softmax state for this (batch, q-tile) ----
    @pl.when(ki == 0)
    def _():
        m_scr[...] = jnp.full_like(m_scr, -jnp.inf)
        l_scr[...] = jnp.zeros_like(l_scr)
        acc_scr[...] = jnp.zeros_like(acc_scr)

    qt = q_ref[0]      # (tq, QK), already scaled
    ktt = kt_ref[0]    # (QK, tk), pre-transposed K
    vt = v_ref[0]      # (tk, D)

    # Heads folded into the body: the kv tile is loaded once and reused for every head.
    for h in range(heads):
        q_h = qt[:, h * d_qk:(h + 1) * d_qk]                        # (tq, d_qk)
        kt_h = ktt[h * d_qk:(h + 1) * d_qk, :]                      # (d_qk, tk) sublane slice
        v_h = vt[:, h * d_v:(h + 1) * d_v]                          # (tk, d_v)

        s = lax.dot_general(q_h, kt_h, (((1,), (0,)), ((), ())),
                            preferred_element_type=jnp.float32)     # (tq, tk)

        m_prev = m_scr[h]                                           # (tq, 1)
        m_new = jnp.maximum(m_prev, jnp.max(s, axis=-1, keepdims=True))
        alpha = jnp.exp(m_prev - m_new)
        p = jnp.exp(s - m_new)
        l_scr[h] = alpha * l_scr[h] + jnp.sum(p, axis=-1, keepdims=True)
        # Keep matmul operands in the input dtype (bf16 inputs -> bf16 PV matmul, f32 accum).
        pv = lax.dot_general(p.astype(v_h.dtype), v_h, (((1,), (0,)), ((), ())),
                             preferred_element_type=jnp.float32)    # (tq, d_v)
        acc_scr[:, h * d_v:(h + 1) * d_v] = (
            alpha * acc_scr[:, h * d_v:(h + 1) * d_v] + pv)
        m_scr[h] = m_new

    # ---- last kv tile: normalize (exact divide), single (tq,D)x(D,D) projection, one store ----
    @pl.when(ki == nk - 1)
    def _():
        for h in range(heads):
            acc_scr[:, h * d_v:(h + 1) * d_v] = (
                acc_scr[:, h * d_v:(h + 1) * d_v] / l_scr[h])
        y = lax.dot_general(acc_scr[...].astype(wp_ref.dtype), wp_ref[...],
                            (((1,), (0,)), ((), ())),
                            preferred_element_type=jnp.float32)     # (tq, D)
        o_ref[0] = y.astype(o_ref.dtype)


# ------------------------------------ Wrapper ------------------------------------

def attention3d(x, wq, wk, wv, wp, *, heads, q_tile=256, kv_tile=256, proj_tile=256):
    """x: (B, N, D); wq/wk: (D, QK); wv/wp: (D, D). Returns (B, N, D)."""
    B, N, D = x.shape
    QK = wq.shape[1]
    assert QK % heads == 0 and D % heads == 0
    d_qk = QK // heads
    d_v = D // heads
    scale = 1.0 / math.sqrt(d_qk)  # SDPA default scale; module's self.scale is unused in forward()

    tn = min(proj_tile, N)
    tq = min(q_tile, N)
    tk = min(kv_tile, N)
    assert N % tn == 0 and N % tq == 0 and N % tk == 0, \
        "sequence length must be a multiple of the tile sizes"
    # Kt kv tiles index the lane dimension, so partial tiles must be 128-aligned.
    assert tk == N or tk % 128 == 0, "kv_tile must be a multiple of 128 (or == N)"
    assert tn == N or tn % 128 == 0, "proj_tile must be a multiple of 128 (or == N)"
    # TODO(synk): masked softmax path for sequence lengths that are not tile multiples.

    # ---- prologue: project Q (scaled), K (transposed), V once, outside the flash loop ----
    q, kt, v = pl.pallas_call(
        functools.partial(_qkv_proj_kernel, scale=scale),
        out_shape=(jax.ShapeDtypeStruct((B, N, QK), x.dtype),
                   jax.ShapeDtypeStruct((B, QK, N), x.dtype),
                   jax.ShapeDtypeStruct((B, N, D), x.dtype)),
        grid_spec=pltpu.PrefetchScalarGridSpec(
            num_scalar_prefetch=0,
            grid=(B, N // tn),
            in_specs=[
                pl.BlockSpec((1, tn, D), lambda b, i: (b, i, 0)),   # x tile
                pl.BlockSpec((D, QK), lambda b, i: (0, 0)),         # Wq (whole, resident)
                pl.BlockSpec((D, QK), lambda b, i: (0, 0)),         # Wk
                pl.BlockSpec((D, D), lambda b, i: (0, 0)),          # Wv
            ],
            out_specs=[
                pl.BlockSpec((1, tn, QK), lambda b, i: (b, i, 0)),  # Q
                pl.BlockSpec((1, QK, tn), lambda b, i: (b, 0, i)),  # K^T
                pl.BlockSpec((1, tn, D), lambda b, i: (b, i, 0)),   # V
            ],
        ),
        compiler_params=pltpu.CompilerParams(
            dimension_semantics=("parallel", "parallel"),
            vmem_limit_bytes=_VMEM_LIMIT_BYTES),
    )(x, wq, wk, wv)

    # ---- flash attention + output projection ----
    kernel = functools.partial(_flash_attn_kernel, heads=heads, d_qk=d_qk, d_v=d_v)
    grid = (B, N // tq, N // tk)

    return pl.pallas_call(
        kernel,
        out_shape=jax.ShapeDtypeStruct((B, N, D), x.dtype),
        grid_spec=pltpu.PrefetchScalarGridSpec(
            num_scalar_prefetch=0,
            grid=grid,
            in_specs=[
                pl.BlockSpec((1, tq, QK), lambda b, qi, ki: (b, qi, 0)),  # Q tile (scaled)
                # kv stream (changes every inner step); could use pipeline_mode=pl.Buffered(3)
                # if the DMA turns out to be exposed.
                pl.BlockSpec((1, QK, tk), lambda b, qi, ki: (b, 0, ki)),  # K^T tile
                pl.BlockSpec((1, tk, D), lambda b, qi, ki: (b, ki, 0)),   # V tile
                pl.BlockSpec((D, D), lambda b, qi, ki: (0, 0)),           # Wproj (whole, resident)
            ],
            out_specs=pl.BlockSpec((1, tq, D), lambda b, qi, ki: (b, qi, 0)),
            scratch_shapes=[
                pltpu.VMEM((heads, tq, 1), jnp.float32),  # running max m (per head)
                pltpu.VMEM((heads, tq, 1), jnp.float32),  # running sum l (per head)
                pltpu.VMEM((tq, D), jnp.float32),         # head-concat PV accumulator
            ],
        ),
        compiler_params=pltpu.CompilerParams(
            dimension_semantics=("parallel", "parallel", "arbitrary"),
            vmem_limit_bytes=_VMEM_LIMIT_BYTES),
    )(q, kt, v, wp)


# ------------------------------------ Reference ------------------------------------

def _reference(x, wq, wk, wv, wp, *, heads):
    B, N, D = x.shape
    hp = "highest"
    q = jnp.dot(x, wq, precision=hp)
    k = jnp.dot(x, wk, precision=hp)
    v = jnp.dot(x, wv, precision=hp)

    def split(t):
        return t.reshape(B, N, heads, -1).transpose(0, 2, 1, 3)

    q, k, v = map(split, (q, k, v))
    scale = 1.0 / math.sqrt(q.shape[-1])
    s = jnp.einsum('bhnd,bhmd->bhnm', q, k, precision=hp) * scale
    p = jax.nn.softmax(s, axis=-1)
    o = jnp.einsum('bhnm,bhmd->bhnd', p, v, precision=hp)
    o = o.transpose(0, 2, 1, 3).reshape(B, N, D)
    return jnp.dot(o, wp, precision=hp)


if __name__ == "__main__":
    # Shapes consistent with the module: dim=32, heads=2, qk_dim=16.
    DIM, HEADS, QK_DIM = 32, 2, 16

    key = jax.random.PRNGKey(0)
    kx, kq, kk, kv, kp = jax.random.split(key, 5)

    # Deterministic weight init (Linear has no bias), stored as (in, out).
    winit = 1.0 / math.sqrt(DIM)
    wq = jax.random.uniform(kq, (DIM, QK_DIM), jnp.float32, -winit, winit)
    wk = jax.random.uniform(kk, (DIM, QK_DIM), jnp.float32, -winit, winit)
    wv = jax.random.uniform(kv, (DIM, DIM), jnp.float32, -winit, winit)
    wp = jax.random.uniform(kp, (DIM, DIM), jnp.float32, -winit, winit)

    # Test 1: single-tile path (B=2, N=8) -> tiles collapse to the full sequence.
    x1 = jax.random.normal(kx, (2, 8, DIM), dtype=jnp.float32)
    out1 = jax.block_until_ready(attention3d(x1, wq, wk, wv, wp, heads=HEADS))
    ref1 = _reference(x1, wq, wk, wv, wp, heads=HEADS)
    assert out1.shape == x1.shape
    assert jnp.allclose(out1, ref1, atol=2e-3, rtol=2e-3), \
        f"max abs err {jnp.max(jnp.abs(out1 - ref1))}"

    # Test 2: multi-tile flash path (B=2, N=256 with 128-wide q/kv tiles) to exercise the
    # online-softmax accumulation across kv grid steps and multiple q tiles.
    x2 = jax.random.normal(jax.random.PRNGKey(1), (2, 256, DIM), dtype=jnp.float32)
    out2 = jax.block_until_ready(
        attention3d(x2, wq, wk, wv, wp, heads=HEADS, q_tile=128, kv_tile=128))
    ref2 = _reference(x2, wq, wk, wv, wp, heads=HEADS)
    assert out2.shape == x2.shape
    assert jnp.allclose(out2, ref2, atol=2e-3, rtol=2e-3), \
        f"max abs err {jnp.max(jnp.abs(out2 - ref2))}"

    print("KERNEL_OK")
</pallas_src>

<mosaic_0001>
module attributes {stable_mosaic.version = 11 : i64} {
  func.func @_qkv_proj_kernel(%arg0: i32, %arg1: i32, %arg2: memref<1x8x32xf32, #tpu.memory_space<vmem>>, %arg3: memref<32x16xf32, #tpu.memory_space<vmem>>, %arg4: memref<32x16xf32, #tpu.memory_space<vmem>>, %arg5: memref<32x32xf32, #tpu.memory_space<vmem>>, %arg6: memref<1x8x16xf32, #tpu.memory_space<vmem>>, %arg7: memref<1x16x8xf32, #tpu.memory_space<vmem>>, %arg8: memref<1x8x32xf32, #tpu.memory_space<vmem>>) attributes {dimension_semantics = [#tpu.dimension_semantics<parallel>, #tpu.dimension_semantics<parallel>], iteration_bounds = array<i64: 2, 1>, scalar_prefetch = 0 : i64, scratch_operands = 0 : i64, tpu.core_type = #tpu.core_type<tc>, window_params = [{transform_indices = @transform_0, window_bounds = array<i64: 1, 8, 32>}, {pipeline_mode = #tpu.pipeline_mode<synchronous>, transform_indices = @transform_1, window_bounds = array<i64: 32, 16>}, {pipeline_mode = #tpu.pipeline_mode<synchronous>, transform_indices = @transform_2, window_bounds = array<i64: 32, 16>}, {pipeline_mode = #tpu.pipeline_mode<synchronous>, transform_indices = @transform_3, window_bounds = array<i64: 32, 32>}, {transform_indices = @transform_4, window_bounds = array<i64: 1, 8, 16>}, {transform_indices = @transform_5, window_bounds = array<i64: 1, 16, 8>}, {transform_indices = @transform_6, window_bounds = array<i64: 1, 8, 32>}]} {
    %c0 = arith.constant 0 : index
    %c0_0 = arith.constant 0 : index
    %c0_1 = arith.constant 0 : index
    %0 = vector.load %arg2[%c0, %c0_0, %c0_1] : memref<1x8x32xf32, #tpu.memory_space<vmem>>, vector<1x8x32xf32>
    %1 = vector.shape_cast %0 : vector<1x8x32xf32> to vector<8x32xf32>
    %c0_2 = arith.constant 0 : index
    %c0_3 = arith.constant 0 : index
    %2 = vector.load %arg3[%c0_2, %c0_3] : memref<32x16xf32, #tpu.memory_space<vmem>>, vector<32x16xf32>
    %cst = arith.constant dense<0.000000e+00> : vector<8x16xf32>
    %3 = tpu.matmul %1, %2, %cst {dimension_numbers = #tpu.dot_dimension_numbers<[1], [0], [0], [1], [0, 0, 1, 1], [], []>} : vector<8x32xf32>, vector<32x16xf32>, vector<8x16xf32> -> vector<8x16xf32>
    %cst_4 = arith.constant 0.353553385 : f32
    %4 = vector.broadcast %cst_4 : f32 to vector<8x16xf32>
    %5 = arith.mulf %3, %4 : vector<8x16xf32>
    %c0_5 = arith.constant 0 : index
    %c0_6 = arith.constant 0 : index
    %c0_7 = arith.constant 0 : index
    %6 = vector.load %arg6[%c0_5, %c0_6, %c0_7] : memref<1x8x16xf32, #tpu.memory_space<vmem>>, vector<1x8x16xf32>
    %7 = vector.shape_cast %6 : vector<1x8x16xf32> to vector<8x16xf32>
    %8 = vector.shape_cast %5 : vector<8x16xf32> to vector<1x8x16xf32>
    tpu.vector_store %arg6[%c0_5, %c0_6, %c0_7], %8 {strides = array<i32>} : memref<1x8x16xf32, #tpu.memory_space<vmem>>, vector<1x8x16xf32>,
    %c0_8 = arith.constant 0 : index
    %c0_9 = arith.constant 0 : index
    %9 = vector.load %arg4[%c0_8, %c0_9] : memref<32x16xf32, #tpu.memory_space<vmem>>, vector<32x16xf32>
    %cst_10 = arith.constant dense<0.000000e+00> : vector<16x8xf32>
    %10 = tpu.matmul %9, %1, %cst_10 {dimension_numbers = #tpu.dot_dimension_numbers<[0], [1], [1], [0], [0, 1, 1, 0], [], []>} : vector<32x16xf32>, vector<8x32xf32>, vector<16x8xf32> -> vector<16x8xf32>
    %c0_11 = arith.constant 0 : index
    %c0_12 = arith.constant 0 : index
    %c0_13 = arith.constant 0 : index
    %11 = vector.load %arg7[%c0_11, %c0_12, %c0_13] : memref<1x16x8xf32, #tpu.memory_space<vmem>>, vector<1x16x8xf32>
    %12 = vector.shape_cast %11 : vector<1x16x8xf32> to vector<16x8xf32>
    %13 = vector.shape_cast %10 : vector<16x8xf32> to vector<1x16x8xf32>
    tpu.vector_store %arg7[%c0_11, %c0_12, %c0_13], %13 {strides = array<i32>} : memref<1x16x8xf32, #tpu.memory_space<vmem>>, vector<1x16x8xf32>,
    %c0_14 = arith.constant 0 : index
    %c0_15 = arith.constant 0 : index
    %14 = vector.load %arg5[%c0_14, %c0_15] : memref<32x32xf32, #tpu.memory_space<vmem>>, vector<32x32xf32>
    %cst_16 = arith.constant dense<0.000000e+00> : vector<8x32xf32>
    %15 = tpu.matmul %1, %14, %cst_16 {dimension_numbers = #tpu.dot_dimension_numbers<[1], [0], [0], [1], [0, 0, 1, 1], [], []>} : vector<8x32xf32>, vector<32x32xf32>, vector<8x32xf32> -> vector<8x32xf32>
    %c0_17 = arith.constant 0 : index
    %c0_18 = arith.constant 0 : index
    %c0_19 = arith.constant 0 : index
    %16 = vector.load %arg8[%c0_17, %c0_18, %c0_19] : memref<1x8x32xf32, #tpu.memory_space<vmem>>, vector<1x8x32xf32>
    %17 = vector.shape_cast %16 : vector<1x8x32xf32> to vector<8x32xf32>
    %18 = vector.shape_cast %15 : vector<8x32xf32> to vector<1x8x32xf32>
    tpu.vector_store %arg8[%c0_17, %c0_18, %c0_19], %18 {strides = array<i32>} : memref<1x8x32xf32, #tpu.memory_space<vmem>>, vector<1x8x32xf32>,
    return
  }
  func.func @transform_0(%arg0: i32, %arg1: i32) -> (i32, i32, i32) {
    %c0_i32 = arith.constant 0 : i32
    %c0_i32_0 = arith.constant 0 : i32
    return %arg0, %arg1, %c0_i32 : i32, i32, i32
  }
  func.func @transform_1(%arg0: i32, %arg1: i32) -> (i32, i32) {
    %c0_i32 = arith.constant 0 : i32
    %c0_i32_0 = arith.constant 0 : i32
    %c0_i32_1 = arith.constant 0 : i32
    return %c0_i32, %c0_i32_0 : i32, i32
  }
  func.func @transform_2(%arg0: i32, %arg1: i32) -> (i32, i32) {
    %c0_i32 = arith.constant 0 : i32
    %c0_i32_0 = arith.constant 0 : i32
    %c0_i32_1 = arith.constant 0 : i32
    return %c0_i32, %c0_i32_0 : i32, i32
  }
  func.func @transform_3(%arg0: i32, %arg1: i32) -> (i32, i32) {
    %c0_i32 = arith.constant 0 : i32
    %c0_i32_0 = arith.constant 0 : i32
    %c0_i32_1 = arith.constant 0 : i32
    return %c0_i32, %c0_i32_0 : i32, i32
  }
  func.func @transform_4(%arg0: i32, %arg1: i32) -> (i32, i32, i32) {
    %c0_i32 = arith.constant 0 : i32
    %c0_i32_0 = arith.constant 0 : i32
    return %arg0, %arg1, %c0_i32 : i32, i32, i32
  }
  func.func @transform_5(%arg0: i32, %arg1: i32) -> (i32, i32, i32) {
    %c0_i32 = arith.constant 0 : i32
    %c0_i32_0 = arith.constant 0 : i32
    return %arg0, %c0_i32, %arg1 : i32, i32, i32
  }
  func.func @transform_6(%arg0: i32, %arg1: i32) -> (i32, i32, i32) {
    %c0_i32 = arith.constant 0 : i32
    %c0_i32_0 = arith.constant 0 : i32
    return %arg0, %arg1, %c0_i32 : i32, i32, i32
  }
}

</mosaic_0001>

<bundles_post_ra>
// kernel: tpu_custom_call.1
= control target key start
LH: loop header
LB: loop body
LE: loop exit
PB: predicated region body
PF: predicated region fallthrough
CT: control target
= control target key end

     0   :  { %s1255_s0 = inlined_call_operand.vmem [shape: f32[2,8,32], index: 0, kind: input, shape index: {}]   ;;  %s1256_s1 = inlined_call_operand.vmem [shape: f32[32,16], index: 1, kind: input, shape index: {}]   ;;  %s1257_s2 = inlined_call_operand.vmem [shape: f32[32,16], index: 2, kind: input, shape index: {}]   ;;  %s1258_s3 = inlined_call_operand.vmem [shape: f32[32,32], index: 3, kind: input, shape index: {}]   ;;  %s1259_s4 = inlined_call_operand.hbm [shape: f32[2,8,16], index: 4, kind: output, shape index: {0}]   ;;  %s1260_s5 = inlined_call_operand.vmem [shape: f32[2,16,8], index: 5, kind: output, shape index: {1}]   ;;  %s1261_s6 = inlined_call_operand.hbm [shape: f32[2,8,32], index: 6, kind: output, shape index: {2}]  }
   0x1   :  { %1263 = sst [smem:[#allocation8_spill]] %s1255_s0 }
   0x2   :  { %1264 = sst [smem:[#allocation9_spill]] %s1256_s1 }
   0x3   :  { %12 = vsyncpa [#allocation3], 0 }
   0x4   :  { %14 = vsyncpa [#allocation3 + $0x1], 0 }
   0x5   :  { %15 = vsyncpa [#allocation5], 0 }
   0x6   :  { %17 = vsyncpa [#allocation5 + $0x1], 0  ;;  %s1056_s21 = smov 0   ;;  %s1058_s22 = smov 0  }
   0x7   :  { %s1060_s23 = smov 0   ;;  %s1062_s24 = smov 0  }
   0x8   :  { %s1064_s25 = smov 0   ;;  %s1066_s26 = smov 0  }
   0x9 LB: > { %s767_s27 = sadd.s32 4294967295, %s1014_s26   ;;  %s768_s28 = sadd.s32 4294967294, %s1014_s26   ;;  %s1014_s26 = sphi %s1066_s26, %s23_s26   ;;  %s1010_s25 = sphi %s1064_s25, %s1274_s25   ;;  %s1006_s24 = sphi %s1062_s24, %s1273_s24   ;;  %s1002_s23 = sphi %s1060_s23, %s1272_s23   ;;  %s998_s22 = sphi %s1058_s22, %s1271_s22   ;;  %s994_s21 = sphi %s1056_s21, %s1270_s21  }
   0xa   : > { %s35_s29 = sadd.s32 1, %s1010_s25  ;;  %s135_s30 = sadd.s32 1, %s1002_s23 }
   0xb   : > { %p37_p0 = scmp.ge.s32.totalorder %s35_s29, 2  ;;  %p145_p1 = scmp.ne.s32.totalorder %s1002_s23, %s998_s22 }
   0xc   : > { %p146_p2 = scmp.eq.s32.totalorder %s767_s27, 1  ;;  %p151_p3 = scmp.ne.s32.totalorder %s998_s22, %s994_s21 }
   0xd   : > { %s1276_s29 = smov (%p37_p0, %s35_s29), 0  ;;  %p152_p5 = scmp.eq.s32.totalorder %s768_s28, 1 }
   0xe   : > { %p1096_p4 = por %p146_p2, %p145_p1  ;;  %s130_s8 = ssub.s32 %s1010_s25, %s1276_s29 }
   0xf   : > { %p771_p6 = scmp.ge.s32.totalorder %s1014_s26, 1  ;;  %p133_p7 = scmp.eq.s32.totalorder %s130_s8, 0 }
  0x10   : > { %p1103_p8 = por %p152_p5, %p151_p3  ;;  %p245_p9 = scmp.lt.s32.totalorder %s1014_s26, 3 }
  0x11   : > { %s1109_s10 = scalar_select %p133_p7, %s1002_s23, %s135_s30  }
  0x12   : > { %p246_p10 = pnand %p771_p6, %p245_p9 }
  0x13   : > { %v387_v0 = vld [vmem:[%s1257_s2] sm:$0xff] (!%p246_p10)  ;;  %p290_p11 = scmp.lt.s32.totalorder (!%p246_p10), %s1006_s24, 1  ;;  %s1267_s1 = sld [smem:[#allocation9_spill]] (!%p246_p10)  ;;  %v388_v3 = vld [vmem:[%s1257_s2 + $0x8] sm:$0xff] (!%p246_p10)  ;;  %v1016_v4 = vmov (!%p246_p10), 0.0|0.0   ;;  %vm310_vm0 = vcmask (!%p246_p10), 261120  }
  0x14   : > { %249 = sbr.rel (%p246_p10) target bundleno = 388 (0x184), region = 36  ;;  %391 = vxpose.xlu0.b32.start [1/4] (short) (narrow) (!%p246_p10), %v387_v0, 16  ;;  %829 = vmatprep.subr.bf16.mxu0 (!%p246_p10), %v1016_v4  ;;  %s1268_s0 = sld [smem:[#allocation8_spill]] (!%p246_p10)  ;;  %v389_v8 = vld [vmem:[%s1257_s2 + $0x10] sm:$0xff] (!%p246_p10)  ;;  %v390_v11 = vld [vmem:[%s1257_s2 + $0x18] sm:$0xff] (!%p246_p10)  ;;  %vm1017_vm1 = vmmov (!%p246_p10), 0  }
  0x15   : > { %v1018_v12 = vmov (!%p246_p10), 0.0   ;;  %v507_v13 = vld [vmem:[%s1258_s3] sm:$0xff] (!%p246_p10)  ;;  %v508_v14 = vld [vmem:[%s1258_s3 + $0x8] sm:$0xff] (!%p246_p10)  ;;  %v509_v17 = vld [vmem:[%s1258_s3 + $0x10] sm:$0xff] (!%p246_p10)  ;;  %s1164_s13 = sand.u32 (!%p246_p10), 1, %s998_s22   ;;  %vm385_vm2 = vcmask (!%p246_p10), 130048  }
  0x16   : > { %810 = vmatprep.mubr.msk.f32.mxu0 (!%p246_p10), %vm1017_vm1, %v1018_v12  ;;  %v836_v16 = vpack.c.bf16 (!%p246_p10), %v508_v14, %v507_v13  ;;  %v510_v18 = vld [vmem:[%s1258_s3 + $0x18] sm:$0xff] (!%p246_p10)  ;;  %s772_s14 = sshll.u32 (!%p246_p10), %s1164_s13, 3  ;;  %s1262_s15 = sshll.u32 (!%p246_p10), %s1006_s24, 7 }
  0x17   : > { %v839_v20 = vpack.c.bf16 (!%p246_p10), %v510_v18, %v509_v17  ;;  %s272_s16 = scalar_lea.vmem (!%p246_p10), [#allocation2], %s772_s14  ;;  %s1175_s27 = scalar_lea.hbm (!%p246_p10), %s1259_s4, %s1262_s15 }
  0x18   : > { %392 = vxpose.xlu0.b32.cont [2/4] (short) (narrow) (!%p246_p10), %v388_v3, 16  ;;  %s610_s17 = sshll.u32 (!%p246_p10), %s272_s16, 4  ;;  %s583_s28 = scalar_lea.sflag (!%p246_p10), [#allocation3], %s1164_s13  ;;  %s611_s17 = int_to_ptr.vmem [resolvable:$true] %s610_s17 }
  0x19   : > { %v306_v1 = vld [vmem:[%s1267_s1] sm:$0xff] (!%p246_p10)  ;;  %v307_v2 = vld [vmem:[%s1267_s1 + $0x8] sm:$0xff] (!%p246_p10)  ;;  %v308_v6 = vld [vmem:[%s1267_s1 + $0x10] sm:$0xff] (!%p246_p10)  ;;  %s1019_s8 = smov (!%p246_p10), [#allocation2]  }
  0x1a   : > { %v830_v5 = vpack.c.bf16 (!%p246_p10), %v307_v2, %v306_v1  ;;  %v309_v7 = vld [vmem:[%s1267_s1 + $0x18] sm:$0xff] (!%p246_p10)  ;;  %s908_s11 = sshll.u32 (!%p246_p10), %s1019_s8, 4  ;;  %s909_s11 = int_to_ptr.vmem [resolvable:$false] %s908_s11 }
  0x1b   : > { %s1125_s19 = scalar_select %p290_p11, %s1006_s24, 1  ;;  %v833_v10 = vpack.c.bf16 %v309_v7, %v308_v6 }
  0x1c   : > { %831 = vmatpush3.bf16.msra.mxu0 %v830_v5  ;;  %393 = vxpose.xlu0.b32.cont [3/4] (short) (narrow) %v389_v8, 16  ;;  %s910_s12 = scalar_lea.vmem %s909_s11, 256  ;;  %p911_p1 = scmp.lt.s32.totalorder %s611_s17, %s909_s11 }
  0x1d   : > { %s774_s20 = sshll.u32 %s1125_s19, 3  ;;  %832 = vmatprep.subr.bf16.mxu0 %v1016_v4 }
  0x1e   : > { %s296_s30 = scalar_lea.vmem %s1268_s0, %s774_s20 }
  0x1f   : > { %v305_v9 = vld [vmem:[%s296_s30] sm:$0xff]  ;;  %s904_s30 = scalar_lea.vmem %s611_s17, 128 }
  0x20   : > { %813 = vmatprep.subr.msk.mxu1 %vm310_vm0, %v305_v9  ;;  %834 = vmatpush3.bf16.msra.mxu0 %v833_v10  ;;  %p905_p12 = scmp.ne.s32.totalorder %s611_s17, %s904_s30  ;;  %p912_p2 = scmp.lt.s32.totalorder %s910_s12, %s904_s30 }
  0x21   : > { %814 = vmatpush3.xpose.msk.msra.mxu1 %vm310_vm0, %v305_v9  ;;  %394 = vxpose.xlu0.b32.end [4/4] (short) (narrow) %v390_v11, 16 }
  0x22   : > { %835 = vmatprep.subr.bf16.mxu1 %v1016_v4  ;;  %p906_p13 = pnand %p905_p12, %p1096_p4  ;;  %p913_p3 = por %p912_p2, %p911_p1 }
  0x23   : > { %811 = vmatmul.mubr.msk.f32.vlgmr.msra.gmra.mrb[0].mxu0 %vm310_vm0, %v305_v9 }
  0x24   : > { %p907_p0 = pneg %p906_p13 }
  0x26   : > { %p914_p5 = pnand %p913_p3, %p907_p0 }
  0x95   : > { %v407_v15 = vpop.trf.xlu0 }
  0x96   : > { %815 = vmatprep.mubr.msk.f32.mxu1 %vm310_vm0, %v407_v15 }
  0x99   : > { %v408_v19 = vpop.trf.xlu0 }
  0x9a   : > { %816 = vmatmul.mubr.msk.f32.vlgmr.msra.gmra.mrb[0].mxu1 %vm310_vm0, %v408_v19 }
  0x9b   : > { %837 = vmatpush3.bf16.msra.mxu1 %v836_v16  ;;  %826 = vmatprep.mubr.msk.f32.mxu1 %vm1017_vm1, %v1018_v12 }
  0x9c   : > { %838 = vmatprep.subr.bf16.mxu1 %v1016_v4 }
  0x9f   : > { %840 = vmatpush3.bf16.msra.mxu1 %v839_v20 }
  0xa2   : > { %827 = vmatmul.mubr.msk.f32.vlgmr.msra.gmra.mrb[2].mxu1 %vm310_vm0, %v305_v9 }
  0xf6   : > { %v380_v21 = vpop.f32.mrb[0].mxu0 }
  0xf7   : > { %v384_v22 = vmul.f32 0.35355338, %v380_v21  ;;  %v812_v23 = vpop.f32.mrb[1].mxu0 }
  0xf9   : > { %386 = vst.msk [vmem:[%s272_s16] sm:$0xff] %vm385_vm2, %v384_v22 }
  0xfa   : > { %917 = shalt.err (!%p914_p5)
}
  0xfb   : > { %s918_s16 = scalar_lea.hbm %s1175_s27, 128  ;;  %s922_s8 = scalar_lea.hbm %s1259_s4, 256 }
  0xfc   : > { %p919_p6 = scmp.ne.s32.totalorder %s1175_s27, %s918_s16  ;;  %p923_p10 = scmp.lt.u32.totalorder %s1175_s27, %s1259_s4 }
  0xfd   : > { %p924_p11 = scmp.lt.u32.totalorder %s922_s8, %s918_s16  ;;  %p926_p13 = scmp.lt.u32.totalorder %s918_s16, %s1175_s27 }
  0xfe   : > { %p920_p7 = pnand %p919_p6, %p1096_p4 }
  0xff   : > { %p925_p12 = por %p924_p11, %p923_p10 }
 0x100   : > { %p921_p9 = pneg %p920_p7 }
 0x101   : > { %p927_p0 = por %p926_p13, %p925_p12 }
 0x103   : > { %p928_p1 = pnand %p927_p0, %p921_p9 }
 0x105   : > { %931 = shalt.err (!%p928_p1)
}
 0x106   : > { %841 = dma.vmem_to_hbm [thread:$0]  (%p1096_p4), %s611_s17, 128, %s1175_s27, %s583_s28   ;;  %vm504_vm3 = vcmask 64512  }
 0x107   : > { %s788_s30 = sshll.u32 %s1125_s19, 4  ;;  %s289_s16 = scalar_lea.vmem [#allocation4], %s772_s14 }
 0x108   : > { %s304_s15 = scalar_lea.vmem %s1260_s5, %s788_s30  ;;  %s627_s20 = sshll.u32 %s289_s16, 4  ;;  %s1208_s20 = int_to_ptr.vmem [resolvable:$true] %s627_s20 }
 0x109   : > { %s1269_s8 = sshll.u32 %s1006_s24, 7  ;;  %s596_s19 = scalar_lea.sflag [#allocation5], %s1164_s13 }
 0x10a   : > { %s1206_s1 = scalar_lea.hbm %s1261_s6, %s1269_s8  ;;  %s932_s17 = scalar_lea.vmem %s1208_s20, 128 }
 0x10b   : > { %p933_p2 = scmp.ne.s32.totalorder %s1208_s20, %s932_s17  ;;  %s1020_s24 = smov [#allocation4]  }
 0x10c   : > { %s936_s14 = sshll.u32 %s1020_s24, 4  ;;  %s937_s14 = int_to_ptr.vmem [resolvable:$false] %s936_s14 }
 0x10d   : > { %p934_p3 = pnand %p933_p2, %p1096_p4  ;;  %s938_s0 = scalar_lea.vmem %s937_s14, 256 }
 0x10e   : > { %p939_p6 = scmp.lt.s32.totalorder %s1208_s20, %s937_s14  ;;  %p940_p7 = scmp.lt.s32.totalorder %s938_s0, %s932_s17 }
 0x10f   : > { %p935_p5 = pneg %p934_p3 }
 0x110   : > { %p941_p9 = por %p940_p7, %p939_p6 }
 0x112   : > { %p942_p10 = pnand %p941_p9, %p935_p5 }
 0x16d   : > { %v817_v24 = vpop.f32.mrb[0].mxu1 }
 0x16e   : > { %506 = vst.msk [vmem:[%s304_s15 + $0x8] sm:$0xff] %vm504_vm3, %v817_v24  ;;  %v495_v25 = vpop.f32.mrb[1].mxu1 }
 0x16f   : > { %505 = vst.msk [vmem:[%s304_s15] sm:$0xff] %vm504_vm3, %v495_v25 }
 0x175   : > { %v577_v26 = vpop.f32.mrb[2].mxu1 }
 0x176   : > { %581 = vst.msk [vmem:[%s289_s16] sm:$0xff] %vm310_vm0, %v577_v26  ;;  %v828_v27 = vpop.f32.mrb[3].mxu1 }
 0x177   : > { %945 = shalt.err (!%p942_p10)
}
 0x178   : > { %s946_s13 = scalar_lea.hbm %s1206_s1, 128  ;;  %s950_s30 = scalar_lea.hbm %s1261_s6, 256 }
 0x179   : > { %p947_p11 = scmp.ne.s32.totalorder %s1206_s1, %s946_s13  ;;  %p951_p0 = scmp.lt.u32.totalorder %s1206_s1, %s1261_s6 }
 0x17a   : > { %p952_p1 = scmp.lt.u32.totalorder %s950_s30, %s946_s13  ;;  %p954_p3 = scmp.lt.u32.totalorder %s946_s13, %s1206_s1 }
 0x17b   : > { %p948_p12 = pnand %p947_p11, %p1096_p4 }
 0x17c   : > { %p953_p2 = por %p952_p1, %p951_p0 }
 0x17d   : > { %p949_p13 = pneg %p948_p12 }
 0x17e   : > { %p955_p5 = por %p954_p3, %p953_p2 }
 0x180   : > { %p956_p6 = pnand %p955_p5, %p949_p13 }
 0x182   : > { %959 = shalt.err (!%p956_p6)
}
 0x183   : > { %842 = dma.vmem_to_hbm [thread:$0]  (%p1096_p4), %s1208_s20, 128, %s1206_s1, %s596_s19  }
 0x184 PF: > { %p852_p7 = scmp.ge.s32.totalorder %s1014_s26, 2  ;;  %s639_s15 = sand.u32 1, %s994_s21  }
 0x185   : > { %s640_s16 = scalar_lea.sflag [#allocation3], %s639_s15 }
 0x186   : > { %p846_p9 = pnand %p852_p7, %p1103_p8 }
 0x188   : > { %985 = dma.done.wait (!%p846_p9), %s640_s16, 128  }
 0x189   : > { %987 = vsyncadd (!%p846_p9), %s640_s16, 4294967168  ;;  %s660_s8 = scalar_lea.sflag [#allocation5], %s639_s15 }
 0x18a   : > { %989 = dma.done.wait (!%p846_p9), %s660_s8, 128  }
 0x18b   : > { %991 = vsyncadd (!%p846_p9), %s660_s8, 4294967168  ;;  %s23_s26 = sadd.s32 1, %s1014_s26   ;;  %s1270_s21 = smov %s998_s22 }
 0x18c   : > { %p20_p10 = scmp.ge.s32.totalorder %s23_s26, 4   ;;  %s1271_s22 = smov %s1002_s23 }
 0x18d   : > { %s1272_s23 = smov %s1109_s10  ;;  %s1273_s24 = smov %s1010_s25 }
 0x18e   : > { %s1274_s25 = smov %s1276_s29  ;;  %22 = sbr.rel (!%p20_p10) target bundleno = 9 (0x9), region = 100 }
 0x195   :  { %665 = vsyncpa [#allocation3], 1 }
 0x196   :  { %667 = vsyncpa [#allocation3 + $0x1], 1 }
 0x197   :  { %668 = vsyncpa [#allocation5], 1 }
 0x198   :  { %670 = vsyncpa [#allocation5 + $0x1], 1 }

</bundles_post_ra>
